<compile_context>
chip_gen: v7x
topology: tpu7x:2x2x1
jax: 0.10.0
libtpu: 0.0.40
codegen_flags: <defaults>
</compile_context>

<pallas_src>
import math
import functools

import jax
import jax.numpy as jnp
from jax.experimental import pallas as pl
from jax.experimental.pallas import tpu as pltpu


def _ffm_body(L, LD, x_ref, coef_ref, keep_ref, out_ref):
    # x_ref:    (TB, D)
    # coef_ref: (1, L*D)   coef_ref[0, i*D+d] = 2**i * pi   (kron layout)
    # keep_ref: (1, L*D)   keep mask for ONE half (or None when everything is kept)
    # out_ref:  (TB, 2*L*D) -> [sin | cos], written as two in-place half stores
    x = x_ref[...]                                           # (TB, D)
    xt = jnp.concatenate([x] * L, axis=-1) if L > 1 else x   # (TB, L*D) == kron column layout
    args = xt * coef_ref[...]                                # exact f32 VPU multiply == kron(coefs, x)
    s = jnp.sin(args)
    c = jnp.cos(args)
    if keep_ref is not None:
        k = keep_ref[...]
        s = s * k
        c = c * k
    # In-place half writes (static offsets): no (TB, 2LD) temp, no extra copy pass.
    out_ref[:, :LD] = s.astype(out_ref.dtype)
    out_ref[:, LD:] = c.astype(out_ref.dtype)


def _ffm_kernel_masked(L, LD, x_ref, coef_ref, keep_ref, out_ref):
    _ffm_body(L, LD, x_ref, coef_ref, keep_ref, out_ref)


def _ffm_kernel_nomask(L, LD, x_ref, coef_ref, out_ref):
    _ffm_body(L, LD, x_ref, coef_ref, None, out_ref)


def _vmem_budget_and_limit():
    """Generation-aware VMEM budget for block sizing + the scoped-VMEM limit to request."""
    cap = 64 * 1024 * 1024  # conservative fallback == v7x per-core physical VMEM
    try:
        cap = int(pltpu.get_tpu_info().vmem_capacity_bytes)
    except Exception:
        pass
    budget = min(24 * 1024 * 1024, cap // 3)          # ~24 MiB on v5e/v6e, ~21 MiB on v7x
    limit = min(cap // 2, budget + 8 * 1024 * 1024)   # raise v5e's 16 MiB scoped default
    return budget, limit


def _pick_block_rows(B, D, L, vmem_budget_bytes):
    """Pick the batch tile: as large as the VMEM budget allows (multi-MiB output blocks to
    amortize the ~0.35us per-grid-step overhead), but at least 2 balanced tiles when B >= 16
    so both v7x TensorCores get work."""
    LD = L * D
    # per-row f32 bytes: 2x double-buffered (x block + out block) + ~6 LD-wide live temps
    bytes_per_row = 4 * (2 * (D + 2 * LD) + 6 * LD)
    tb = max(8, (vmem_budget_bytes // bytes_per_row) // 8 * 8)
    if B > tb:
        return tb
    if B >= 16:
        half = (B + 1) // 2
        return max(8, ((half + 7) // 8) * 8)
    return B


def ffm_layer_v2(x, L=10, frac=1.0, block_rows=None, out_dtype=None):
    """Pallas implementation of FFMLayer_v2.forward. x: (B, rep_dim) f32 -> (B, 2*L*rep_dim)."""
    B, D = x.shape
    LD = L * D
    out_dtype = x.dtype if out_dtype is None else out_dtype

    # Non-trainable "parameter": 2**arange(L) * pi, laid out lane-dense in kron order.
    coefs = (2.0 ** jnp.arange(L, dtype=x.dtype)) * math.pi            # (L,)
    coef_row = jnp.repeat(coefs, D).reshape(1, LD)                     # (1, L*D)

    # Static cutoff on the flat L*D axis (exactly as the torch code does).
    cutoff = int(round(L * frac))
    use_mask = cutoff < LD                                             # skip mask if everything kept

    vmem_budget, vmem_limit = _vmem_budget_and_limit()
    if block_rows is not None:
        TB = min(int(block_rows), B)
        if TB < B:
            TB = max(8, (TB // 8) * 8)                                 # keep (8,128) tiling legal
    else:
        TB = _pick_block_rows(B, D, L, vmem_budget)
    grid = (pl.cdiv(B, TB),)

    in_specs = [
        pl.BlockSpec((TB, D), lambda b: (b, 0)),          # batch tile of x
        pl.BlockSpec((1, LD), lambda b: (0, 0)),          # coef row (constant across grid)
    ]
    args = [x, coef_row]
    if use_mask:
        keep_row = (jnp.arange(LD) < cutoff).astype(x.dtype).reshape(1, LD)
        in_specs.append(pl.BlockSpec((1, LD), lambda b: (0, 0)))
        args.append(keep_row)
        kernel = functools.partial(_ffm_kernel_masked, L, LD)
    else:
        kernel = functools.partial(_ffm_kernel_nomask, L, LD)

    itemsize_out = jnp.dtype(out_dtype).itemsize
    cost = pl.CostEstimate(
        flops=int(B * LD + (2 * B * LD if use_mask else 0)),
        transcendentals=int(2 * B * LD),
        bytes_accessed=int(4 * (B * D + LD + (LD if use_mask else 0)) + B * 2 * LD * itemsize_out),
    )

    out = pl.pallas_call(
        kernel,
        out_shape=jax.ShapeDtypeStruct((B, 2 * LD), out_dtype),
        grid=grid,
        in_specs=in_specs,
        out_specs=pl.BlockSpec((TB, 2 * LD), lambda b: (b, 0)),
        compiler_params=pltpu.CompilerParams(
            dimension_semantics=("parallel",),            # shard the batch grid over v7x's 2 TCs
            vmem_limit_bytes=int(vmem_limit),
        ),
        cost_estimate=cost,
    )(*args)
    return out


def _reference(x, L=10, frac=1.0):
    """Plain-JAX reference mirroring the torch code exactly."""
    B, D = x.shape
    coefs = (2.0 ** jnp.arange(L, dtype=x.dtype)) * math.pi
    arg = jnp.kron(coefs, x)                  # (B, L*D)
    out1 = jnp.sin(arg)
    out2 = jnp.cos(arg)
    cutoff = int(round(L * frac))
    keep = (jnp.arange(L * D) < cutoff)[None, :]
    out1 = jnp.where(keep, out1, 0.0)
    out2 = jnp.where(keep, out2, 0.0)
    return jnp.concatenate([out1, out2], axis=1)   # hstack


if __name__ == "__main__":
    B, rep_dim, L = 2, 4, 10
    key = jax.random.PRNGKey(0)
    x = jax.random.normal(key, (B, rep_dim), dtype=jnp.float32)

    # default frac=1.0 (cutoff = L on the flat L*D axis, faithful to the torch source)
    out = jax.block_until_ready(ffm_layer_v2(x, L=L, frac=1.0))
    ref = _reference(x, L=L, frac=1.0)
    assert out.shape == (B, 2 * L * rep_dim), out.shape
    assert jnp.allclose(out, ref, atol=1e-5, rtol=1e-5), "mismatch vs reference (frac=1.0)"

    # partial cutoff
    out_half = jax.block_until_ready(ffm_layer_v2(x, L=L, frac=0.5))
    ref_half = _reference(x, L=L, frac=0.5)
    assert jnp.allclose(out_half, ref_half, atol=1e-5, rtol=1e-5), "mismatch vs reference (frac=0.5)"

    # mask-free fast path (cutoff >= L*D)
    out_full = jax.block_until_ready(ffm_layer_v2(x, L=L, frac=float(rep_dim)))
    ref_full = _reference(x, L=L, frac=float(rep_dim))
    assert jnp.allclose(out_full, ref_full, atol=1e-5, rtol=1e-5), "mismatch vs reference (no-mask)"

    # larger batch: auto-tiled path (>=2 grid steps for megacore) and explicit tiling
    B2 = 64
    x2 = jax.random.normal(jax.random.PRNGKey(0), (B2, rep_dim), dtype=jnp.float32)
    ref2 = _reference(x2, L=L, frac=1.0)

    out2 = jax.block_until_ready(ffm_layer_v2(x2, L=L, frac=1.0))
    assert out2.shape == (B2, 2 * L * rep_dim), out2.shape
    assert jnp.allclose(out2, ref2, atol=1e-5, rtol=1e-5), "mismatch vs reference (auto-tiled)"

    out3 = jax.block_until_ready(ffm_layer_v2(x2, L=L, frac=1.0, block_rows=16))
    assert jnp.allclose(out3, ref2, atol=1e-5, rtol=1e-5), "mismatch vs reference (block_rows=16)"

    print("KERNEL_OK")
</pallas_src>

<mosaic_0001>
module attributes {stable_mosaic.version = 11 : i64} {
  func.func @_ffm_kernel_masked(%arg0: i32, %arg1: memref<2x4xf32, #tpu.memory_space<vmem>>, %arg2: memref<1x40xf32, #tpu.memory_space<vmem>>, %arg3: memref<1x40xf32, #tpu.memory_space<vmem>>, %arg4: memref<2x80xf32, #tpu.memory_space<vmem>>) attributes {dimension_semantics = [#tpu.dimension_semantics<parallel>], iteration_bounds = array<i64: 1>, scalar_prefetch = 0 : i64, scratch_operands = 0 : i64, tpu.core_type = #tpu.core_type<tc>, window_params = [{transform_indices = @transform_0, window_bounds = array<i64: 2, 4>}, {pipeline_mode = #tpu.pipeline_mode<synchronous>, transform_indices = @transform_1, window_bounds = array<i64: 1, 40>}, {pipeline_mode = #tpu.pipeline_mode<synchronous>, transform_indices = @transform_2, window_bounds = array<i64: 1, 40>}, {transform_indices = @transform_3, window_bounds = array<i64: 2, 80>}]} {
    %c0 = arith.constant 0 : index
    %c0_0 = arith.constant 0 : index
    %0 = vector.load %arg1[%c0, %c0_0] : memref<2x4xf32, #tpu.memory_space<vmem>>, vector<2x4xf32>
    %1 = tpu.concatenate %0, %0, %0, %0, %0, %0, %0, %0, %0, %0 in 1 : vector<2x4xf32>, vector<2x4xf32>, vector<2x4xf32>, vector<2x4xf32>, vector<2x4xf32>, vector<2x4xf32>, vector<2x4xf32>, vector<2x4xf32>, vector<2x4xf32>, vector<2x4xf32> -> vector<2x40xf32>
    %c0_1 = arith.constant 0 : index
    %c0_2 = arith.constant 0 : index
    %2 = vector.load %arg2[%c0_1, %c0_2] : memref<1x40xf32, #tpu.memory_space<vmem>>, vector<1x40xf32>
    %3 = vector.broadcast %2 : vector<1x40xf32> to vector<2x40xf32>
    %4 = arith.mulf %1, %3 : vector<2x40xf32>
    %5 = math.sin %4 : vector<2x40xf32>
    %6 = math.cos %4 : vector<2x40xf32>
    %c0_3 = arith.constant 0 : index
    %c0_4 = arith.constant 0 : index
    %7 = vector.load %arg3[%c0_3, %c0_4] : memref<1x40xf32, #tpu.memory_space<vmem>>, vector<1x40xf32>
    %8 = vector.broadcast %7 : vector<1x40xf32> to vector<2x40xf32>
    %9 = arith.mulf %5, %8 : vector<2x40xf32>
    %10 = vector.broadcast %7 : vector<1x40xf32> to vector<2x40xf32>
    %11 = arith.mulf %6, %10 : vector<2x40xf32>
    %c0_5 = arith.constant 0 : index
    %c0_6 = arith.constant 0 : index
    %12 = vector.load %arg4[%c0_5, %c0_6] : memref<2x80xf32, #tpu.memory_space<vmem>>, vector<2x40xf32>
    tpu.vector_store %arg4[%c0_5, %c0_6], %9 {strides = array<i32>} : memref<2x80xf32, #tpu.memory_space<vmem>>, vector<2x40xf32>,
    %c0_7 = arith.constant 0 : index
    %c40 = arith.constant 40 : index
    %13 = vector.load %arg4[%c0_7, %c40] : memref<2x80xf32, #tpu.memory_space<vmem>>, vector<2x40xf32>
    tpu.vector_store %arg4[%c0_7, %c40], %11 {strides = array<i32>} : memref<2x80xf32, #tpu.memory_space<vmem>>, vector<2x40xf32>,
    return
  }
  func.func @transform_0(%arg0: i32) -> (i32, i32) {
    %c0_i32 = arith.constant 0 : i32
    %c0_i32_0 = arith.constant 0 : i32
    return %arg0, %c0_i32 : i32, i32
  }
  func.func @transform_1(%arg0: i32) -> (i32, i32) {
    %c0_i32 = arith.constant 0 : i32
    %c0_i32_0 = arith.constant 0 : i32
    %c0_i32_1 = arith.constant 0 : i32
    return %c0_i32, %c0_i32_0 : i32, i32
  }
  func.func @transform_2(%arg0: i32) -> (i32, i32) {
    %c0_i32 = arith.constant 0 : i32
    %c0_i32_0 = arith.constant 0 : i32
    %c0_i32_1 = arith.constant 0 : i32
    return %c0_i32, %c0_i32_0 : i32, i32
  }
  func.func @transform_3(%arg0: i32) -> (i32, i32) {
    %c0_i32 = arith.constant 0 : i32
    %c0_i32_0 = arith.constant 0 : i32
    return %arg0, %c0_i32 : i32, i32
  }
}

</mosaic_0001>

<bundles_post_ra>
// kernel: tpu_custom_call.1
= control target key start
LH: loop header
LB: loop body
LE: loop exit
PB: predicated region body
PF: predicated region fallthrough
CT: control target
= control target key end

     0   :  { %8 = vsyncpa [#allocation3], 0  ;;  %s494_s0 = inlined_call_operand.hbm [shape: f32[2,4], index: 0, kind: input, shape index: {}]   ;;  %s495_s1 = inlined_call_operand.vmem [shape: f32[1,40], index: 1, kind: input, shape index: {}]   ;;  %s496_s2 = inlined_call_operand.vmem [shape: f32[1,40], index: 2, kind: input, shape index: {}]   ;;  %s497_s3 = inlined_call_operand.hbm [shape: f32[2,80], index: 3, kind: output, shape index: {}]  }
   0x1   :  { %9 = vsyncpa [#allocation4], 0  ;;  %s405_s12 = smov [#allocation2]   ;;  %s357_s16 = scalar_lea.hbm %s494_s0, 32 }
   0x2   :  { %s16_s13 = sshll.u32 %s405_s12, 4  ;;  %p358_p0 = scmp.ne.s32.totalorder %s494_s0, %s357_s16  ;;  %s17_s13 = int_to_ptr.vmem [resolvable:$true] %s16_s13 }
   0x3   :  { %p361_p1 = scmp.lt.u32.totalorder %s357_s16, %s494_s0 }
   0x5   :  { %p363_p2 = pnand %p361_p1, %p358_p0 }
   0x7   :  { %366 = shalt.err (!%p363_p2)
}
   0x8   :  { %s367_s21 = scalar_lea.vmem %s17_s13, 32  ;;  %p372_p4 = scmp.lt.s32.totalorder %s17_s13, %s17_s13 }
   0x9   :  { %p368_p3 = scmp.ne.s32.totalorder %s17_s13, %s367_s21  ;;  %p373_p5 = scmp.lt.s32.totalorder %s367_s21, %s367_s21 }
   0xb   :  { %p374_p6 = por %p373_p5, %p372_p4 }
   0xd   :  { %p375_p7 = pnand %p374_p6, %p368_p3 }
   0xf   :  { %378 = shalt.err (!%p375_p7)
}
  0x10   :  { %19 = dma.hbm_to_vmem [thread:$0]  %s494_s0, 32, %s17_s13, [#allocation3]  }
  0x11   :  { %401 = dma.done.wait [#allocation3], 32  }
  0x12   :  { %402 = vsyncadd [#allocation3], 4294967264  ;;  %v27_v0 = vld [vmem:[#allocation2] sm:$0x3]  ;;  %s406_s24 = smov 4   ;;  %s407_s25 = smov 12  }
  0x13   :  { %29 = vrot.lane.b32.xlu0 %v27_v0, %s406_s24  ;;  %35 = vrot.lane.b32.xlu1 %v27_v0, %s407_s25  ;;  %s408_s26 = smov 8   ;;  %s409_s27 = smov 16   ;;  %vm56_vm0 = vcmask 31744   ;;  %vm58_vm1 = vcmask 64512   ;;  %vm60_vm2 = vcmask 97280   ;;  %vm62_vm3 = vcmask 130048  }
  0x14   :  { %s410_s28 = smov 20   ;;  %s411_s29 = smov 24   ;;  %vm64_vm4 = vcmask 162816   ;;  %vm66_vm5 = vcmask 195584   ;;  %vm68_vm6 = vcmask 228352   ;;  %vm70_vm7 = vcmask 261120  }
  0x15   :  { %s412_s30 = smov 28   ;;  %s413_s4 = smov 32   ;;  %vm72_vm8 = vcmask 293888   ;;  %v321_v16 = vld [vmem:[%s495_s1] ss:$0 sm:$0xff] }
  0x16   :  { %s414_s0 = smov 36   ;;  %v415_v31 = vmov 683565275   ;;  %v416_v33 = vmov 2475754826   ;;  %s421_s8 = smov 40  }
  0x17   :  { %32 = vrot.lane.b32.xlu0 %v27_v0, %s408_s26  ;;  %38 = vrot.lane.b32.xlu1 %v27_v0, %s409_s27  ;;  %v417_v36 = vmov 2131351028   ;;  %v418_v39 = vmov 2102212464   ;;  %v419_v42 = vmov 920167782  }
  0x18   :  { %v420_v45 = vmov 1326507024   ;;  %s422_s9 = smov [#allocation5]  }
  0x19   :  { %s312_s10 = sshll.u32 %s422_s9, 4  ;;  %s313_s10 = int_to_ptr.vmem [resolvable:$true] %s312_s10 }
  0x1a   :  { %p384_p9 = scmp.lt.s32.totalorder %s313_s10, %s313_s10 }
  0x1b   :  { %41 = vrot.lane.b32.xlu0 %v27_v0, %s410_s28  ;;  %44 = vrot.lane.b32.xlu1 %v27_v0, %s411_s29 }
  0x1f   :  { %47 = vrot.lane.b32.xlu0 %v27_v0, %s412_s30  ;;  %50 = vrot.lane.b32.xlu1 %v27_v0, %s413_s4 }
  0x23   :  { %53 = vrot.lane.b32.xlu0 %v27_v0, %s414_s0 }
  0x85   :  { %v30_v1 = vpop.permute.xlu0 %29  ;;  %v36_v2 = vpop.permute.xlu1 %35 }
  0x86   :  { %v57_v3 = vsel %vm56_vm0, %v27_v0, %v30_v1 }
  0x89   :  { %v33_v4 = vpop.permute.xlu0 %32  ;;  %v39_v5 = vpop.permute.xlu1 %38 }
  0x8a   :  { %v59_v6 = vsel %vm58_vm1, %v57_v3, %v33_v4 }
  0x8b   :  { %v61_v7 = vsel %vm60_vm2, %v59_v6, %v36_v2 }
  0x8c   :  { %v63_v8 = vsel %vm62_vm3, %v61_v7, %v39_v5 }
  0x8d   :  { %v42_v9 = vpop.permute.xlu0 %41  ;;  %v45_v10 = vpop.permute.xlu1 %44 }
  0x8e   :  { %v65_v11 = vsel %vm64_vm4, %v63_v8, %v42_v9 }
  0x8f   :  { %v67_v12 = vsel %vm66_vm5, %v65_v11, %v45_v10 }
  0x91   :  { %v48_v13 = vpop.permute.xlu0 %47  ;;  %v51_v15 = vpop.permute.xlu1 %50 }
  0x92   :  { %v69_v14 = vsel %vm68_vm6, %v67_v12, %v48_v13 }
  0x93   :  { %v71_v17 = vsel %vm70_vm7, %v69_v14, %v51_v15 }
  0x95   :  { %v54_v18 = vpop.permute.xlu0 %53 }
  0x96   :  { %v73_v19 = vsel %vm72_vm8, %v71_v17, %v54_v18 }
  0x97   :  { %v458_v20 = vmul.f32 %v321_v16, %v73_v19 }
  0x99   :  { %v85_v21 = vand.u32 2139095040, %v458_v20  ;;  %v82_v25 = vand.u32 2147483647, %v458_v20  ;;  %vm84_vm0 = vcmp.lt.s32.totalorder %v458_v20, 0  ;;  %vm174_vm8 = vweird.f32 %v458_v20 }
  0x9b   :  { %v86_v22 = vshrl.u32 %v85_v21, 23  ;;  %v89_v28 = vand.u32 8388607, %v82_v25  ;;  %vm83_vm1 = vcmp.le.f32.partialorder %v82_v25, 0.7853982 }
  0x9d   :  { %v322_v23 = vadd.s32 4294967169, %v86_v22  ;;  %v90_v47 = vor.u32 8388608, %v89_v28 }
  0x9f   :  { %v92_v24 = vadd.s32 1, %v322_v23  ;;  %v130_v61 = vshll.u32 %v90_v47, 8 }
  0xa1   :  { %vm93_vm9 = vcmp.gt.s32.totalorder %v92_v24, 0 }
  0xa2   :  { %v94_v26 = vsel %vm93_vm9, %v92_v24, 0  ;;  %vm298_vm9 = vcmask 320512  }
  0xa3   :  { %v96_v27 = vand.u32 31, %v94_v26  ;;  %v95_v30 = vshrl.u32 %v94_v26, 5 }
  0xa5   :  { %v97_v29 = vsub.s32 32, %v96_v27  ;;  %v99_v32 = vshll.u32 %v415_v31, %v96_v27  ;;  %v102_v34 = vshll.u32 %v416_v33, %v96_v27  ;;  %v105_v38 = vshll.u32 %v417_v36, %v96_v27 }
  0xa6   :  { %v108_v41 = vshll.u32 %v418_v39, %v96_v27  ;;  %v111_v44 = vshll.u32 %v419_v42, %v96_v27  ;;  %vm114_vm10 = vcmp.lt.s32.totalorder %v95_v30, 1  ;;  %vm117_vm11 = vcmp.lt.s32.totalorder %v95_v30, 4 }
  0xa7   :  { %v100_v35 = vshrl.u32 %v416_v33, %v97_v29  ;;  %v103_v37 = vshrl.u32 %v417_v36, %v97_v29  ;;  %v106_v40 = vshrl.u32 %v418_v39, %v97_v29  ;;  %v109_v43 = vshrl.u32 %v419_v42, %v97_v29 }
  0xa8   :  { %v112_v46 = vshrl.u32 %v420_v45, %v97_v29  ;;  %v98_v56 = vshrl.u32 %v415_v31, %v97_v29  ;;  %vm116_vm12 = vcmp.lt.s32.totalorder %v95_v30, 3  ;;  %vm115_vm13 = vcmp.lt.s32.totalorder %v95_v30, 2 }
  0xa9   :  { %v101_v48 = vor.u32 %v100_v35, %v99_v32  ;;  %v104_v49 = vor.u32 %v103_v37, %v102_v34  ;;  %v107_v50 = vor.u32 %v106_v40, %v105_v38  ;;  %v110_v51 = vor.u32 %v109_v43, %v108_v41 }
  0xaa   :  { %v113_v52 = vor.u32 %v112_v46, %v111_v44 }
  0xab   :  { %v119_v53 = vsel %vm117_vm11, %v107_v50, 2102212464  ;;  %v122_v54 = vsel %vm114_vm10, %v101_v48, %v104_v49  ;;  %v126_v55 = vsel %vm114_vm10, %v104_v49, %v107_v50  ;;  %v123_v57 = vsel %vm117_vm11, %v110_v51, 920167782 }
  0xac   :  { %v127_v58 = vsel %vm117_vm11, %v113_v52, 1326507024  ;;  %v124_v59 = vsel %vm116_vm12, %v107_v50, %v123_v57  ;;  %v118_v62 = vsel %vm114_vm10, %v98_v56, %v101_v48  ;;  %v120_v63 = vsel %vm116_vm12, %v104_v49, %v119_v53  ;;  %v330_v49 = vld [vmem:[%s496_s2] ss:$0 sm:$0xff]  ;;  %s379_s2 = scalar_lea.vmem %s313_s10, 32 }
  0xad   :  { %v128_v60 = vsel %vm116_vm12, %v110_v51, %v127_v58  ;;  %v125_v0 = vsel %vm115_vm13, %v122_v54, %v124_v59  ;;  %v121_v6 = vsel %vm115_vm13, %v118_v62, %v120_v63  ;;  %vm304_vm10 = vcmask 648512   ;;  %p380_p8 = scmp.ne.s32.totalorder %s313_s10, %s379_s2  ;;  %p385_p10 = scmp.lt.s32.totalorder %s379_s2, %s379_s2 }
  0xae   :  { %v129_v1 = vsel %vm115_vm13, %v126_v55, %v128_v60  ;;  %v467_v4 = vmul.u32.u64.low %v130_v61, %v125_v0  ;;  %v468_v5 = vmul.u32.u64.high %v130_v61, %v125_v0, %v467_v4  ;;  %v137_v8 = vmul.u32 %v130_v61, %v121_v6 }
  0xaf   :  { %v464_v2 = vmul.u32.u64.low %v130_v61, %v129_v1  ;;  %v465_v3 = vmul.u32.u64.high %v130_v61, %v129_v1, %v464_v2  ;;  %p386_p11 = por %p385_p10, %p384_p9 }
  0xb0   :  { %v140_v7 = vadd.s32 1, %v468_v5 }
  0xb1   :  { %vm139_vm14 = vc.u32 %v465_v3, %v467_v4  ;;  %v138_v21 = vadd.s32 %v467_v4, %v465_v3  ;;  %p387_p12 = pnand %p386_p11, %p380_p8 }
  0xb2   :  { %v141_v9 = vsel %vm139_vm14, %v140_v7, %v468_v5 }
  0xb3   :  { %v142_v10 = vadd.s32 %v141_v9, %v137_v8 }
  0xb5   :  { %v143_v11 = vadd.s32 536870912, %v142_v10 }
  0xb7   :  { %v144_v12 = vshrl.u32 %v143_v11, 30 }
  0xb9   :  { %v145_v13 = vshll.u32 %v144_v12, 30  ;;  %v168_v34 = vsub.s32 4, %v144_v12 }
  0xbb   :  { %v146_v14 = vsub.s32 %v142_v10, %v145_v13  ;;  %v169_v37 = vsel %vm84_vm0, %v168_v34, %v144_v12 }
  0xbc   :  { %v171_v39 = vsel %vm83_vm1, 0, %v169_v37 }
  0xbd   :  { %v148_v15 = vsub.s32 0, %v146_v14  ;;  %v175_v40 = vadd.s32 3, %v171_v39  ;;  %v279_v42 = vand.u32 3, %v171_v39 }
  0xbf   :  { %v323_v16 = vmin.u32 %v148_v15, %v146_v14  ;;  %v176_v41 = vand.u32 3, %v175_v40  ;;  %vm284_vm3 = vcmp.eq.s32.totalorder %v279_v42, 2  ;;  %vm281_vm5 = vcmp.eq.s32.totalorder %v279_v42, 0 }
  0xc0   :  { %vm280_vm7 = vcmp.lt.s32.totalorder %v279_v42, 2 }
  0xc1   :  { %v150_v17 = vclz %v323_v16  ;;  %vm181_vm2 = vcmp.eq.s32.totalorder %v176_v41, 2  ;;  %vm178_vm4 = vcmp.eq.s32.totalorder %v176_v41, 0  ;;  %vm177_vm6 = vcmp.lt.s32.totalorder %v176_v41, 2 }
  0xc3   :  { %v324_v18 = vadd.s32 4294967294, %v150_v17 }
  0xc5   :  { %vm325_vm15 = vcmp.lt.s32.totalorder %v324_v18, 0 }
  0xc6   :  { %v153_v19 = vsel %vm325_vm15, 0, %v324_v18 }
  0xc7   :  { %v154_v22 = vsub.s32 32, %v153_v19  ;;  %v158_v23 = vsub.s32 4294967266, %v153_v19  ;;  %v155_v24 = vshll.u32 %v146_v14, %v153_v19 }
  0xc9   :  { %v156_v26 = vshrl.u32 %v138_v21, %v154_v22  ;;  %v159_v27 = vadd.s32 127, %v158_v23 }
  0xcb   :  { %v157_v28 = vor.u32 %v156_v26, %v155_v24  ;;  %v160_v29 = vshll.u32 %v159_v27, 23 }
  0xcd   :  { %v161_v30 = vor.u32 4788187, %v160_v29  ;;  %v164_v32 = vcvt.s32.f32 %v157_v28 }
  0xcf   :  { %v162_v31 = vand.u32 2147483647, %v161_v30 }
  0xd1   :  { %v165_v33 = vmul.f32 %v164_v32, %v162_v31 }
  0xd3   :  { %v166_v35 = vxor.u32 2147483648, %v165_v33 }
  0xd5   :  { %v167_v36 = vsel %vm84_vm0, %v166_v35, %v165_v33 }
  0xd6   :  { %v170_v38 = vsel %vm83_vm1, %v458_v20, %v167_v36 }
  0xd7   :  { %353 = vcosq.f32 %v170_v38 }
  0xd8   :  { %355 = vsinq.f32 %v170_v38 }
  0xe1   :  { %v354_v43 = vpop.eup %353 }
  0xe2   :  { %v356_v44 = vpop.eup %355  ;;  %v182_v45 = vxor.u32 2147483648, %v354_v43 }
  0xe3   :  { %v179_v46 = vxor.u32 2147483648, %v356_v44 }
  0xe4   :  { %v286_v47 = vsel %vm284_vm3, %v182_v45, %v356_v44  ;;  %v183_v48 = vsel %vm181_vm2, %v182_v45, %v356_v44 }
  0xe5   :  { %v283_v25 = vsel %vm281_vm5, %v354_v43, %v179_v46  ;;  %v180_v50 = vsel %vm178_vm4, %v354_v43, %v179_v46 }
  0xe6   :  { %v287_v51 = vsel %vm280_vm7, %v283_v25, %v286_v47  ;;  %v184_v52 = vsel %vm177_vm6, %v180_v50, %v183_v48 }
  0xe7   :  { %v288_v53 = vsel %vm174_vm8, nan, %v287_v51  ;;  %v185_v54 = vsel %vm174_vm8, nan, %v184_v52 }
  0xe8   :  { %v297_v55 = vmul.f32 %v330_v49, %v288_v53  ;;  %v296_v56 = vmul.f32 %v330_v49, %v185_v54 }
  0xea   :  { %301 = vrot.lane.b32.xlu1 %v297_v55, %s421_s8  ;;  %299 = vst.msk [vmem:[#allocation5] sm:$0x3] %vm298_vm9, %v296_v56 }
 0x15c   :  { %v302_v57 = vpop.permute.xlu1 %301 }
 0x15d   :  { %305 = vst.msk [vmem:[#allocation5] sm:$0x3] %vm304_vm10, %v302_v57 }
 0x15e   :  { %390 = shalt.err (!%p387_p12)
}
 0x15f   :  { %s391_s13 = scalar_lea.hbm %s497_s3, 32 }
 0x160   :  { %p392_p13 = scmp.ne.s32.totalorder %s497_s3, %s391_s13  ;;  %p395_p0 = scmp.lt.u32.totalorder %s391_s13, %s497_s3 }
 0x162   :  { %p397_p1 = pnand %p395_p0, %p392_p13 }
 0x164   :  { %400 = shalt.err (!%p397_p1)
}
 0x165   :  { %315 = dma.vmem_to_hbm [thread:$0]  %s313_s10, 32, %s497_s3, [#allocation4]  }
 0x166   :  { %403 = dma.done.wait [#allocation4], 32  }
 0x167   :  { %404 = vsyncadd [#allocation4], 4294967264 }
 0x168   :  { %319 = vsyncpa [#allocation3], 1 }
 0x169   :  { %320 = vsyncpa [#allocation4], 1 }

</bundles_post_ra>
